<compile_context>
chip_gen: v5e
topology: v5e:2x2
jax: 0.10.0
libtpu: 0.0.40
codegen_flags: <defaults>
</compile_context>

<pallas_src>
import functools
import math

import jax
import jax.numpy as jnp
from jax.experimental import pallas as pl
from jax.experimental.pallas import tpu as pltpu

LANE = 128     # TPU vreg lane width
SUBLANE = 8    # TPU vreg sublane count (f32)


def _round_up(x, m):
    return ((x + m - 1) // m) * m


def _fused_mlp_kernel(*args, num_layers):
    """args = (x_ref, w0, b0, w1, b1, ..., w_{L-1}, b_{L-1}, o_ref, h_a, h_b).

    x_ref:  [B_pad, P]   padded input activations
    w_i:    [P, P]       pre-transposed ([IN, OUT]) zero-padded weights
    b_i:    [1, P]       zero-padded bias
    o_ref:  [B_pad, P]   padded output (sliced in the wrapper)
    h_a/b:  [B_pad, P]   VMEM ping-pong scratch for intermediate activations
    """
    x_ref = args[0]
    o_ref = args[1 + 2 * num_layers]
    bufs = (args[2 + 2 * num_layers], args[3 + 2 * num_layers])

    src_ref = x_ref
    for i in range(num_layers):
        w_ref = args[1 + 2 * i]
        b_ref = args[2 + 2 * i]
        # Weights are already [IN, OUT]: contraction needs no transpose.
        y = jnp.dot(src_ref[...], w_ref[...],
                    preferred_element_type=jnp.float32) + b_ref[...]
        if i < num_layers - 1:
            dst = bufs[i % 2]
            dst[...] = jnp.tanh(y)          # EUP tanh, lane-dense 128-wide store
            src_ref = dst
        else:
            o_ref[...] = y.astype(o_ref.dtype)   # only the final tile goes to HBM


def init_fc_network_params(key, input_size, hidden_size, output_size, depth):
    """Deterministic init mimicking torch.nn.Linear defaults
    (uniform(-1/sqrt(fan_in), 1/sqrt(fan_in)) for weight and bias).
    Stored PyTorch-style: w [out_features, in_features], b [out_features]."""
    sizes = [(input_size, hidden_size)]
    sizes += [(hidden_size, hidden_size) for _ in range(depth)]
    sizes += [(hidden_size, output_size)]
    params = []
    for fan_in, fan_out in sizes:
        key, kw, kb = jax.random.split(key, 3)
        bound = 1.0 / math.sqrt(fan_in)
        w = jax.random.uniform(kw, (fan_out, fan_in), jnp.float32, -bound, bound)
        b = jax.random.uniform(kb, (fan_out,), jnp.float32, -bound, bound)
        params.append((w, b))
    return params


def pack_params(params):
    """One-time prep: transpose to [IN, OUT] and zero-pad every feature dim to a
    common lane-aligned width P. Zero padding keeps the math exact."""
    dims = set()
    for w, _ in params:
        dims.add(w.shape[0])
        dims.add(w.shape[1])
    p = _round_up(max(dims), LANE)
    packed = []
    for w, b in params:
        out_f, in_f = w.shape
        wt = jnp.zeros((p, p), jnp.float32).at[:in_f, :out_f].set(w.T)
        bp = jnp.zeros((1, p), jnp.float32).at[:, :out_f].set(b)
        packed.append((wt, bp))
    return packed, p


def fc_network_forward(packed_params, pad_dim, x, output_size):
    """Fused forward pass: one pallas_call for the whole network."""
    B, in_f = x.shape
    P = pad_dim
    B_pad = _round_up(B, SUBLANE)
    num_layers = len(packed_params)

    x_pad = jnp.zeros((B_pad, P), jnp.float32).at[:B, :in_f].set(x)

    flat_params = []
    in_specs = [pl.BlockSpec((B_pad, P), lambda i: (0, 0))]
    for w, b in packed_params:
        flat_params += [w, b]
        in_specs.append(pl.BlockSpec((P, P), lambda i: (0, 0)))
        in_specs.append(pl.BlockSpec((1, P), lambda i: (0, 0)))

    itemsize = 4  # f32
    cost = pl.CostEstimate(
        flops=2 * B_pad * P * P * num_layers,
        transcendentals=(num_layers - 1) * B_pad * P,
        bytes_accessed=itemsize * (B_pad * P                      # x
                                   + num_layers * (P * P + P)     # weights + biases
                                   + B_pad * P),                  # output
    )

    kernel = functools.partial(_fused_mlp_kernel, num_layers=num_layers)
    out_pad = pl.pallas_call(
        kernel,
        out_shape=jax.ShapeDtypeStruct((B_pad, P), jnp.float32),
        grid=(1,),
        in_specs=in_specs,
        out_specs=pl.BlockSpec((B_pad, P), lambda i: (0, 0)),
        scratch_shapes=[
            pltpu.VMEM((B_pad, P), jnp.float32),   # ping
            pltpu.VMEM((B_pad, P), jnp.float32),   # pong
        ],
        compiler_params=pltpu.CompilerParams(
            dimension_semantics=("arbitrary",),
        ),
        cost_estimate=cost,
    )(x_pad, *flat_params)

    # Slice the real result out of the lane-padded tile exactly once.
    return out_pad[:B, :output_size]


def fc_network_reference(params, x):
    """Pure-JAX reference (matches FC_Network.forward semantics)."""
    n = len(params)
    h = x
    for i, (w, b) in enumerate(params):
        h = h @ w.T + b
        if i < n - 1:
            h = jnp.tanh(h)
    return h


if __name__ == "__main__":
    input_size, hidden_size, output_size, depth = 32, 32, 16, 2
    batch = 8

    key = jax.random.PRNGKey(0)
    key, kx = jax.random.split(key)
    x = jax.random.normal(kx, (batch, input_size), jnp.float32)

    params = init_fc_network_params(key, input_size, hidden_size, output_size, depth)
    packed, pad_dim = pack_params(params)

    out = fc_network_forward(packed, pad_dim, x, output_size)
    out = jax.block_until_ready(out)

    ref = fc_network_reference(params, x)
    assert out.shape == (batch, output_size)
    assert jnp.allclose(out, ref, atol=1e-5, rtol=1e-5)

    print("KERNEL_OK")
</pallas_src>

<mosaic_0001>
module attributes {stable_mosaic.version = 11 : i64} {
  func.func @_fused_mlp_kernel(%arg0: i32, %arg1: memref<8x128xf32, #tpu.memory_space<vmem>>, %arg2: memref<128x128xf32, #tpu.memory_space<vmem>>, %arg3: memref<1x128xf32, #tpu.memory_space<vmem>>, %arg4: memref<128x128xf32, #tpu.memory_space<vmem>>, %arg5: memref<1x128xf32, #tpu.memory_space<vmem>>, %arg6: memref<128x128xf32, #tpu.memory_space<vmem>>, %arg7: memref<1x128xf32, #tpu.memory_space<vmem>>, %arg8: memref<128x128xf32, #tpu.memory_space<vmem>>, %arg9: memref<1x128xf32, #tpu.memory_space<vmem>>, %arg10: memref<8x128xf32, #tpu.memory_space<vmem>>, %arg11: memref<8x128xf32, #tpu.memory_space<vmem>>, %arg12: memref<8x128xf32, #tpu.memory_space<vmem>>) attributes {dimension_semantics = [#tpu.dimension_semantics<arbitrary>], iteration_bounds = array<i64: 1>, scalar_prefetch = 0 : i64, scratch_operands = 2 : i64, tpu.core_type = #tpu.core_type<tc>, window_params = [{pipeline_mode = #tpu.pipeline_mode<synchronous>, transform_indices = @transform_0, window_bounds = array<i64: 8, 128>}, {pipeline_mode = #tpu.pipeline_mode<synchronous>, transform_indices = @transform_1, window_bounds = array<i64: 128, 128>}, {pipeline_mode = #tpu.pipeline_mode<synchronous>, transform_indices = @transform_2, window_bounds = array<i64: 1, 128>}, {pipeline_mode = #tpu.pipeline_mode<synchronous>, transform_indices = @transform_3, window_bounds = array<i64: 128, 128>}, {pipeline_mode = #tpu.pipeline_mode<synchronous>, transform_indices = @transform_4, window_bounds = array<i64: 1, 128>}, {pipeline_mode = #tpu.pipeline_mode<synchronous>, transform_indices = @transform_5, window_bounds = array<i64: 128, 128>}, {pipeline_mode = #tpu.pipeline_mode<synchronous>, transform_indices = @transform_6, window_bounds = array<i64: 1, 128>}, {pipeline_mode = #tpu.pipeline_mode<synchronous>, transform_indices = @transform_7, window_bounds = array<i64: 128, 128>}, {pipeline_mode = #tpu.pipeline_mode<synchronous>, transform_indices = @transform_8, window_bounds = array<i64: 1, 128>}, {pipeline_mode = #tpu.pipeline_mode<synchronous>, transform_indices = @transform_9, window_bounds = array<i64: 8, 128>}]} {
    %c0 = arith.constant 0 : index
    %c0_0 = arith.constant 0 : index
    %0 = vector.load %arg1[%c0, %c0_0] : memref<8x128xf32, #tpu.memory_space<vmem>>, vector<8x128xf32>
    %c0_1 = arith.constant 0 : index
    %c0_2 = arith.constant 0 : index
    %1 = vector.load %arg2[%c0_1, %c0_2] : memref<128x128xf32, #tpu.memory_space<vmem>>, vector<128x128xf32>
    %cst = arith.constant dense<0.000000e+00> : vector<8x128xf32>
    %2 = tpu.matmul %0, %1, %cst {dimension_numbers = #tpu.dot_dimension_numbers<[1], [0], [0], [1], [0, 0, 1, 1], [], []>} : vector<8x128xf32>, vector<128x128xf32>, vector<8x128xf32> -> vector<8x128xf32>
    %c0_3 = arith.constant 0 : index
    %c0_4 = arith.constant 0 : index
    %3 = vector.load %arg3[%c0_3, %c0_4] : memref<1x128xf32, #tpu.memory_space<vmem>>, vector<1x128xf32>
    %4 = vector.broadcast %3 : vector<1x128xf32> to vector<8x128xf32>
    %5 = arith.addf %2, %4 : vector<8x128xf32>
    %6 = math.tanh %5 : vector<8x128xf32>
    %c0_5 = arith.constant 0 : index
    %c0_6 = arith.constant 0 : index
    %7 = vector.load %arg11[%c0_5, %c0_6] : memref<8x128xf32, #tpu.memory_space<vmem>>, vector<8x128xf32>
    tpu.vector_store %arg11[%c0_5, %c0_6], %6 {strides = array<i32>} : memref<8x128xf32, #tpu.memory_space<vmem>>, vector<8x128xf32>,
    %c0_7 = arith.constant 0 : index
    %c0_8 = arith.constant 0 : index
    %8 = vector.load %arg11[%c0_7, %c0_8] : memref<8x128xf32, #tpu.memory_space<vmem>>, vector<8x128xf32>
    %c0_9 = arith.constant 0 : index
    %c0_10 = arith.constant 0 : index
    %9 = vector.load %arg4[%c0_9, %c0_10] : memref<128x128xf32, #tpu.memory_space<vmem>>, vector<128x128xf32>
    %cst_11 = arith.constant dense<0.000000e+00> : vector<8x128xf32>
    %10 = tpu.matmul %8, %9, %cst_11 {dimension_numbers = #tpu.dot_dimension_numbers<[1], [0], [0], [1], [0, 0, 1, 1], [], []>} : vector<8x128xf32>, vector<128x128xf32>, vector<8x128xf32> -> vector<8x128xf32>
    %c0_12 = arith.constant 0 : index
    %c0_13 = arith.constant 0 : index
    %11 = vector.load %arg5[%c0_12, %c0_13] : memref<1x128xf32, #tpu.memory_space<vmem>>, vector<1x128xf32>
    %12 = vector.broadcast %11 : vector<1x128xf32> to vector<8x128xf32>
    %13 = arith.addf %10, %12 : vector<8x128xf32>
    %14 = math.tanh %13 : vector<8x128xf32>
    %c0_14 = arith.constant 0 : index
    %c0_15 = arith.constant 0 : index
    %15 = vector.load %arg12[%c0_14, %c0_15] : memref<8x128xf32, #tpu.memory_space<vmem>>, vector<8x128xf32>
    tpu.vector_store %arg12[%c0_14, %c0_15], %14 {strides = array<i32>} : memref<8x128xf32, #tpu.memory_space<vmem>>, vector<8x128xf32>,
    %c0_16 = arith.constant 0 : index
    %c0_17 = arith.constant 0 : index
    %16 = vector.load %arg12[%c0_16, %c0_17] : memref<8x128xf32, #tpu.memory_space<vmem>>, vector<8x128xf32>
    %c0_18 = arith.constant 0 : index
    %c0_19 = arith.constant 0 : index
    %17 = vector.load %arg6[%c0_18, %c0_19] : memref<128x128xf32, #tpu.memory_space<vmem>>, vector<128x128xf32>
    %cst_20 = arith.constant dense<0.000000e+00> : vector<8x128xf32>
    %18 = tpu.matmul %16, %17, %cst_20 {dimension_numbers = #tpu.dot_dimension_numbers<[1], [0], [0], [1], [0, 0, 1, 1], [], []>} : vector<8x128xf32>, vector<128x128xf32>, vector<8x128xf32> -> vector<8x128xf32>
    %c0_21 = arith.constant 0 : index
    %c0_22 = arith.constant 0 : index
    %19 = vector.load %arg7[%c0_21, %c0_22] : memref<1x128xf32, #tpu.memory_space<vmem>>, vector<1x128xf32>
    %20 = vector.broadcast %19 : vector<1x128xf32> to vector<8x128xf32>
    %21 = arith.addf %18, %20 : vector<8x128xf32>
    %22 = math.tanh %21 : vector<8x128xf32>
    %c0_23 = arith.constant 0 : index
    %c0_24 = arith.constant 0 : index
    %23 = vector.load %arg11[%c0_23, %c0_24] : memref<8x128xf32, #tpu.memory_space<vmem>>, vector<8x128xf32>
    tpu.vector_store %arg11[%c0_23, %c0_24], %22 {strides = array<i32>} : memref<8x128xf32, #tpu.memory_space<vmem>>, vector<8x128xf32>,
    %c0_25 = arith.constant 0 : index
    %c0_26 = arith.constant 0 : index
    %24 = vector.load %arg11[%c0_25, %c0_26] : memref<8x128xf32, #tpu.memory_space<vmem>>, vector<8x128xf32>
    %c0_27 = arith.constant 0 : index
    %c0_28 = arith.constant 0 : index
    %25 = vector.load %arg8[%c0_27, %c0_28] : memref<128x128xf32, #tpu.memory_space<vmem>>, vector<128x128xf32>
    %cst_29 = arith.constant dense<0.000000e+00> : vector<8x128xf32>
    %26 = tpu.matmul %24, %25, %cst_29 {dimension_numbers = #tpu.dot_dimension_numbers<[1], [0], [0], [1], [0, 0, 1, 1], [], []>} : vector<8x128xf32>, vector<128x128xf32>, vector<8x128xf32> -> vector<8x128xf32>
    %c0_30 = arith.constant 0 : index
    %c0_31 = arith.constant 0 : index
    %27 = vector.load %arg9[%c0_30, %c0_31] : memref<1x128xf32, #tpu.memory_space<vmem>>, vector<1x128xf32>
    %28 = vector.broadcast %27 : vector<1x128xf32> to vector<8x128xf32>
    %29 = arith.addf %26, %28 : vector<8x128xf32>
    %c0_32 = arith.constant 0 : index
    %c0_33 = arith.constant 0 : index
    %30 = vector.load %arg10[%c0_32, %c0_33] : memref<8x128xf32, #tpu.memory_space<vmem>>, vector<8x128xf32>
    tpu.vector_store %arg10[%c0_32, %c0_33], %29 {strides = array<i32>} : memref<8x128xf32, #tpu.memory_space<vmem>>, vector<8x128xf32>,
    return
  }
  func.func @transform_0(%arg0: i32) -> (i32, i32) {
    %c0_i32 = arith.constant 0 : i32
    %c0_i32_0 = arith.constant 0 : i32
    %c0_i32_1 = arith.constant 0 : i32
    return %c0_i32, %c0_i32_0 : i32, i32
  }
  func.func @transform_1(%arg0: i32) -> (i32, i32) {
    %c0_i32 = arith.constant 0 : i32
    %c0_i32_0 = arith.constant 0 : i32
    %c0_i32_1 = arith.constant 0 : i32
    return %c0_i32, %c0_i32_0 : i32, i32
  }
  func.func @transform_2(%arg0: i32) -> (i32, i32) {
    %c0_i32 = arith.constant 0 : i32
    %c0_i32_0 = arith.constant 0 : i32
    %c0_i32_1 = arith.constant 0 : i32
    return %c0_i32, %c0_i32_0 : i32, i32
  }
  func.func @transform_3(%arg0: i32) -> (i32, i32) {
    %c0_i32 = arith.constant 0 : i32
    %c0_i32_0 = arith.constant 0 : i32
    %c0_i32_1 = arith.constant 0 : i32
    return %c0_i32, %c0_i32_0 : i32, i32
  }
  func.func @transform_4(%arg0: i32) -> (i32, i32) {
    %c0_i32 = arith.constant 0 : i32
    %c0_i32_0 = arith.constant 0 : i32
    %c0_i32_1 = arith.constant 0 : i32
    return %c0_i32, %c0_i32_0 : i32, i32
  }
  func.func @transform_5(%arg0: i32) -> (i32, i32) {
    %c0_i32 = arith.constant 0 : i32
    %c0_i32_0 = arith.constant 0 : i32
    %c0_i32_1 = arith.constant 0 : i32
    return %c0_i32, %c0_i32_0 : i32, i32
  }
  func.func @transform_6(%arg0: i32) -> (i32, i32) {
    %c0_i32 = arith.constant 0 : i32
    %c0_i32_0 = arith.constant 0 : i32
    %c0_i32_1 = arith.constant 0 : i32
    return %c0_i32, %c0_i32_0 : i32, i32
  }
  func.func @transform_7(%arg0: i32) -> (i32, i32) {
    %c0_i32 = arith.constant 0 : i32
    %c0_i32_0 = arith.constant 0 : i32
    %c0_i32_1 = arith.constant 0 : i32
    return %c0_i32, %c0_i32_0 : i32, i32
  }
  func.func @transform_8(%arg0: i32) -> (i32, i32) {
    %c0_i32 = arith.constant 0 : i32
    %c0_i32_0 = arith.constant 0 : i32
    %c0_i32_1 = arith.constant 0 : i32
    return %c0_i32, %c0_i32_0 : i32, i32
  }
  func.func @transform_9(%arg0: i32) -> (i32, i32) {
    %c0_i32 = arith.constant 0 : i32
    %c0_i32_0 = arith.constant 0 : i32
    %c0_i32_1 = arith.constant 0 : i32
    return %c0_i32, %c0_i32_0 : i32, i32
  }
}

</mosaic_0001>

<bundles_post_ra>
// kernel: tpu_custom_call.1
= control target key start
LH: loop header
LB: loop body
LE: loop exit
PB: predicated region body
PF: predicated region fallthrough
CT: control target
= control target key end

     0   :  { %14 = vsyncpa [#allocation5], 0  ;;  %s557_s0 = inlined_call_operand.hbm [shape: f32[8,128], index: 0, kind: input, shape index: {}]   ;;  %s558_s1 = inlined_call_operand.hbm [shape: f32[128,128], index: 1, kind: input, shape index: {}]   ;;  %s559_s2 = inlined_call_operand.vmem [shape: f32[1,128], index: 2, kind: input, shape index: {}]   ;;  %s560_s3 = inlined_call_operand.hbm [shape: f32[128,128], index: 3, kind: input, shape index: {}]   ;;  %s561_s4 = inlined_call_operand.vmem [shape: f32[1,128], index: 4, kind: input, shape index: {}]   ;;  %s562_s5 = inlined_call_operand.hbm [shape: f32[128,128], index: 5, kind: input, shape index: {}]   ;;  %s563_s6 = inlined_call_operand.vmem [shape: f32[1,128], index: 6, kind: input, shape index: {}]   ;;  %s564_s7 = inlined_call_operand.hbm [shape: f32[128,128], index: 7, kind: input, shape index: {}]   ;;  %s565_s8 = inlined_call_operand.vmem [shape: f32[1,128], index: 8, kind: input, shape index: {}]   ;;  %s566_s9 = inlined_call_operand.hbm [shape: f32[8,128], index: 9, kind: output, shape index: {}]  }
   0x1   :  { %15 = vsyncpa [#allocation8], 0 }
   0x2   :  { %16 = vsyncpa [#allocation11], 0  ;;  %s33_s11 = sshll.u32 %s558_s1, 4  ;;  %s34_s11 = int_to_ptr.hbm [resolvable:$true] %s33_s11 }
   0x3   :  { %17 = vsyncpa [#allocation6], 0  ;;  %s469_s12 = smov [#allocation7]   ;;  %s63_s16 = sshll.u32 %s562_s5, 4  ;;  %s64_s16 = int_to_ptr.hbm [resolvable:$true] %s63_s16 }
   0x4   :  { %s35_s13 = sshll.u32 %s469_s12, 4  ;;  %s470_s17 = smov 128   ;;  %s36_s13 = int_to_ptr.vmem [resolvable:$true] %s35_s13 }
   0x5   :  { %s471_s18 = smov 8   ;;  %s472_s19 = smov [#allocation10]  }
   0x6   :  { %41 = dma.hbm_to_vmem [thread:$0]  %s34_s11, 2048, %s36_s13, [#allocation8], %s470_s17, %s470_s17, %s471_s18  }
   0x7   :  { %s65_s20 = sshll.u32 %s472_s19, 4  ;;  %s23_s23 = sshll.u32 %s557_s0, 4  ;;  %s66_s20 = int_to_ptr.vmem [resolvable:$true] %s65_s20  ;;  %s24_s23 = int_to_ptr.hbm [resolvable:$true] %s23_s23 }
   0x8   :  { %71 = dma.hbm_to_vmem [thread:$0]  %s64_s16, 2048, %s66_s20, [#allocation11], %s470_s17, %s470_s17, %s471_s18  }
   0x9   :  { %s48_s25 = sshll.u32 %s560_s3, 4  ;;  %s473_s26 = smov [#allocation4]   ;;  %s49_s25 = int_to_ptr.hbm [resolvable:$true] %s48_s25 }
   0xa   :  { %s25_s27 = sshll.u32 %s473_s26, 4  ;;  %s474_s5 = smov [#allocation9]   ;;  %s26_s27 = int_to_ptr.vmem [resolvable:$true] %s25_s27 }
   0xb   :  { %28 = dma.hbm_to_vmem [thread:$0]  %s24_s23, 128, %s26_s27, [#allocation5]  }
   0xc   :  { %s50_s28 = sshll.u32 %s474_s5, 4  ;;  %s78_s10 = sshll.u32 %s564_s7, 4  ;;  %s51_s28 = int_to_ptr.vmem [resolvable:$true] %s50_s28  ;;  %s79_s10 = int_to_ptr.hbm [resolvable:$true] %s78_s10 }
   0xd   :  { %56 = dma.hbm_to_vmem [thread:$0]  %s49_s25, 2048, %s51_s28, [#allocation8], %s470_s17, %s470_s17, %s471_s18  }
   0xe   :  { %s475_s0 = smov [#allocation12]  }
   0xf   :  { %s80_s11 = sshll.u32 %s475_s0, 4  ;;  %s81_s11 = int_to_ptr.vmem [resolvable:$true] %s80_s11 }
  0x10   :  { %86 = dma.hbm_to_vmem [thread:$0]  %s79_s10, 2048, %s81_s11, [#allocation11], %s470_s17, %s470_s17, %s471_s18  }
  0x11   :  { %461 = dma.done.wait [#allocation5], 128  }
  0x12   :  { %462 = vsyncadd [#allocation5], 4294967168 }
  0x13   :  { %463 = dma.done.wait [#allocation8], 4096  }
  0x14   :  { %464 = vsyncadd [#allocation8], 4294963200 }
  0x15   :  { %465 = dma.done.wait [#allocation11], 4096  }
  0x16   :  { %466 = vsyncadd [#allocation11], 4294963200  ;;  %v125_v0 = vld [vmem:[#allocation7 + $0x78] sm:$0xff]  ;;  %v124_v1 = vld [vmem:[#allocation7 + $0x70] sm:$0xff]  ;;  %s476_s16 = smov [#allocation13]   ;;  %s287_s20 = sshll.u32 %s566_s9, 4  ;;  %s288_s20 = int_to_ptr.hbm [resolvable:$true] %s287_s20 }
  0x17   :  { %130 = vmatpush.msra.mxu0 %v125_v0  ;;  %v123_v2 = vld [vmem:[#allocation7 + $0x68] sm:$0xff]  ;;  %v122_v3 = vld [vmem:[#allocation7 + $0x60] sm:$0xff]  ;;  %v168_v4 = vld [vmem:[#allocation9 + $0x78] sm:$0xff]  ;;  %s285_s17 = sshll.u32 %s476_s16, 4  ;;  %s286_s17 = int_to_ptr.vmem [resolvable:$true] %s285_s17 }
  0x18   :  { %v121_v5 = vld [vmem:[#allocation7 + $0x58] sm:$0xff]  ;;  %173 = vmatpush.msra.mxu1 %v168_v4  ;;  %v167_v6 = vld [vmem:[#allocation9 + $0x70] sm:$0xff]  ;;  %v166_v7 = vld [vmem:[#allocation9 + $0x68] sm:$0xff] }
  0x19   :  { %131 = vmatpush.msra.mxu0 %v124_v1  ;;  %v120_v8 = vld [vmem:[#allocation7 + $0x50] sm:$0xff]  ;;  %v119_v9 = vld [vmem:[#allocation7 + $0x48] sm:$0xff]  ;;  %v165_v10 = vld [vmem:[#allocation9 + $0x60] sm:$0xff] }
  0x1a   :  { %174 = vmatpush.msra.mxu1 %v167_v6  ;;  %v164_v11 = vld [vmem:[#allocation9 + $0x58] sm:$0xff]  ;;  %v118_v12 = vld [vmem:[#allocation7 + $0x40] sm:$0xff]  ;;  %v163_v13 = vld [vmem:[#allocation9 + $0x50] sm:$0xff] }
  0x1b   :  { %132 = vmatpush.msra.mxu0 %v123_v2  ;;  %v117_v14 = vld [vmem:[#allocation7 + $0x38] sm:$0xff]  ;;  %v162_v15 = vld [vmem:[#allocation9 + $0x48] sm:$0xff]  ;;  %v116_v16 = vld [vmem:[#allocation7 + $0x30] sm:$0xff] }
  0x1c   :  { %175 = vmatpush.msra.mxu1 %v166_v7  ;;  %v161_v17 = vld [vmem:[#allocation9 + $0x40] sm:$0xff]  ;;  %v115_v18 = vld [vmem:[#allocation7 + $0x28] sm:$0xff]  ;;  %v160_v19 = vld [vmem:[#allocation9 + $0x38] sm:$0xff] }
  0x1d   :  { %133 = vmatpush.msra.mxu0 %v122_v3  ;;  %v114_v20 = vld [vmem:[#allocation7 + $0x20] sm:$0xff]  ;;  %v159_v21 = vld [vmem:[#allocation9 + $0x30] sm:$0xff]  ;;  %v113_v22 = vld [vmem:[#allocation7 + $0x18] sm:$0xff] }
  0x1e   :  { %176 = vmatpush.msra.mxu1 %v165_v10  ;;  %v158_v23 = vld [vmem:[#allocation9 + $0x28] sm:$0xff]  ;;  %v112_v24 = vld [vmem:[#allocation7 + $0x10] sm:$0xff]  ;;  %v110_v26 = vld [vmem:[#allocation7] sm:$0xff] }
  0x1f   :  { %134 = vmatpush.msra.mxu0 %v121_v5  ;;  %v111_v25 = vld [vmem:[#allocation7 + $0x8] sm:$0xff]  ;;  %v109_v27 = vld [vmem:[#allocation4] sm:$0xff]  ;;  %v157_v28 = vld [vmem:[#allocation9 + $0x20] sm:$0xff] }
  0x20   :  { %177 = vmatpush.msra.mxu1 %v164_v11  ;;  %v156_v29 = vld [vmem:[#allocation9 + $0x18] sm:$0xff]  ;;  %v155_v30 = vld [vmem:[#allocation9 + $0x10] sm:$0xff]  ;;  %v154_v31 = vld [vmem:[#allocation9 + $0x8] sm:$0xff] }
  0x21   :  { %135 = vmatpush.msra.mxu0 %v120_v8  ;;  %v153_v32 = vld [vmem:[#allocation9] sm:$0xff]  ;;  %v211_v33 = vld [vmem:[#allocation10 + $0x78] sm:$0xff]  ;;  %v210_v34 = vld [vmem:[#allocation10 + $0x70] sm:$0xff] }
  0x22   :  { %178 = vmatpush.msra.mxu1 %v163_v13  ;;  %216 = vmatpush.msra.mxu2 %v211_v33  ;;  %v209_v35 = vld [vmem:[#allocation10 + $0x68] sm:$0xff]  ;;  %v208_v36 = vld [vmem:[#allocation10 + $0x60] sm:$0xff]  ;;  %v207_v37 = vld [vmem:[#allocation10 + $0x58] sm:$0xff] }
  0x23   :  { %136 = vmatpush.msra.mxu0 %v119_v9  ;;  %v206_v38 = vld [vmem:[#allocation10 + $0x50] sm:$0xff]  ;;  %v205_v39 = vld [vmem:[#allocation10 + $0x48] sm:$0xff]  ;;  %v204_v40 = vld [vmem:[#allocation10 + $0x40] sm:$0xff] }
  0x24   :  { %179 = vmatpush.msra.mxu1 %v162_v15  ;;  %217 = vmatpush.msra.mxu2 %v210_v34  ;;  %v203_v41 = vld [vmem:[#allocation10 + $0x38] sm:$0xff]  ;;  %v202_v42 = vld [vmem:[#allocation10 + $0x30] sm:$0xff]  ;;  %v201_v43 = vld [vmem:[#allocation10 + $0x28] sm:$0xff] }
  0x25   :  { %137 = vmatpush.msra.mxu0 %v118_v12  ;;  %v307_v44 = vld [vmem:[%s559_s2] ss:$0 sm:$0xff]  ;;  %v200_v48 = vld [vmem:[#allocation10 + $0x20] sm:$0xff]  ;;  %v198_v50 = vld [vmem:[#allocation10 + $0x10] sm:$0xff] }
  0x26   :  { %180 = vmatpush.msra.mxu1 %v161_v17  ;;  %218 = vmatpush.msra.mxu2 %v209_v35  ;;  %v199_v49 = vld [vmem:[#allocation10 + $0x18] sm:$0xff]  ;;  %v197_v51 = vld [vmem:[#allocation10 + $0x8] sm:$0xff]  ;;  %v196_v52 = vld [vmem:[#allocation10] sm:$0xff] }
  0x27   :  { %138 = vmatpush.msra.mxu0 %v117_v14  ;;  %v254_v53 = vld [vmem:[#allocation12 + $0x78] sm:$0xff]  ;;  %v253_v54 = vld [vmem:[#allocation12 + $0x70] sm:$0xff]  ;;  %v252_v55 = vld [vmem:[#allocation12 + $0x68] sm:$0xff] }
  0x28   :  { %181 = vmatpush.msra.mxu1 %v160_v19  ;;  %219 = vmatpush.msra.mxu2 %v208_v36  ;;  %v251_v56 = vld [vmem:[#allocation12 + $0x60] sm:$0xff]  ;;  %v250_v57 = vld [vmem:[#allocation12 + $0x58] sm:$0xff]  ;;  %v249_v58 = vld [vmem:[#allocation12 + $0x50] sm:$0xff] }
  0x29   :  { %139 = vmatpush.msra.mxu0 %v116_v16  ;;  %259 = vmatpush.msra.mxu3 %v254_v53  ;;  %v248_v59 = vld [vmem:[#allocation12 + $0x48] sm:$0xff]  ;;  %v247_v60 = vld [vmem:[#allocation12 + $0x40] sm:$0xff]  ;;  %v246_v61 = vld [vmem:[#allocation12 + $0x38] sm:$0xff] }
  0x2a   :  { %182 = vmatpush.msra.mxu1 %v159_v21  ;;  %220 = vmatpush.msra.mxu2 %v207_v37  ;;  %v245_v62 = vld [vmem:[#allocation12 + $0x30] sm:$0xff]  ;;  %v244_v63 = vld [vmem:[#allocation12 + $0x28] sm:$0xff]  ;;  %v308_v0 = vld [vmem:[%s561_s4] ss:$0 sm:$0xff] }
  0x2b   :  { %140 = vmatpush.msra.mxu0 %v115_v18  ;;  %260 = vmatpush.msra.mxu3 %v253_v54  ;;  %v243_v4 = vld [vmem:[#allocation12 + $0x20] sm:$0xff]  ;;  %v242_v5 = vld [vmem:[#allocation12 + $0x18] sm:$0xff]  ;;  %v241_v6 = vld [vmem:[#allocation12 + $0x10] sm:$0xff] }
  0x2c   :  { %183 = vmatpush.msra.mxu1 %v158_v23  ;;  %221 = vmatpush.msra.mxu2 %v206_v38  ;;  %v240_v7 = vld [vmem:[#allocation12 + $0x8] sm:$0xff]  ;;  %v239_v8 = vld [vmem:[#allocation12] sm:$0xff]  ;;  %v309_v9 = vld [vmem:[%s563_s6] ss:$0 sm:$0xff] }
  0x2d   :  { %141 = vmatpush.msra.mxu0 %v114_v20  ;;  %261 = vmatpush.msra.mxu3 %v252_v55  ;;  %v310_v13 = vld [vmem:[%s565_s8] ss:$0 sm:$0xff] }
  0x2e   :  { %184 = vmatpush.msra.mxu1 %v157_v28  ;;  %222 = vmatpush.msra.mxu2 %v205_v39 }
  0x2f   :  { %142 = vmatpush.msra.mxu0 %v113_v22  ;;  %262 = vmatpush.msra.mxu3 %v251_v56 }
  0x30   :  { %185 = vmatpush.msra.mxu1 %v156_v29  ;;  %223 = vmatpush.msra.mxu2 %v204_v40 }
  0x31   :  { %143 = vmatpush.msra.mxu0 %v112_v24  ;;  %263 = vmatpush.msra.mxu3 %v250_v57 }
  0x32   :  { %186 = vmatpush.msra.mxu1 %v155_v30  ;;  %224 = vmatpush.msra.mxu2 %v203_v41 }
  0x33   :  { %144 = vmatpush.msra.mxu0 %v111_v25  ;;  %264 = vmatpush.msra.mxu3 %v249_v58 }
  0x34   :  { %187 = vmatpush.msra.mxu1 %v154_v31  ;;  %225 = vmatpush.msra.mxu2 %v202_v42 }
  0x35   :  { %145 = vmatpush.msra.mxu0 %v110_v26  ;;  %265 = vmatpush.msra.mxu3 %v248_v59 }
  0x36   :  { %146 = vmatmul.f32.vlgmr.msra.gmra.mxu0 %v109_v27  ;;  %188 = vmatpush.msra.mxu1 %v153_v32 }
  0x37   :  { %226 = vmatpush.msra.mxu2 %v201_v43  ;;  %266 = vmatpush.msra.mxu3 %v247_v60 }
  0x39   :  { %227 = vmatpush.msra.mxu2 %v200_v48  ;;  %267 = vmatpush.msra.mxu3 %v246_v61 }
  0x3b   :  { %228 = vmatpush.msra.mxu2 %v199_v49  ;;  %268 = vmatpush.msra.mxu3 %v245_v62 }
  0x3d   :  { %229 = vmatpush.msra.mxu2 %v198_v50  ;;  %269 = vmatpush.msra.mxu3 %v244_v63 }
  0x3f   :  { %230 = vmatpush.msra.mxu2 %v197_v51  ;;  %270 = vmatpush.msra.mxu3 %v243_v4 }
  0x41   :  { %231 = vmatpush.msra.mxu2 %v196_v52  ;;  %271 = vmatpush.msra.mxu3 %v242_v5 }
  0x43   :  { %272 = vmatpush.msra.mxu3 %v241_v6 }
  0x45   :  { %273 = vmatpush.msra.mxu3 %v240_v7 }
  0x47   :  { %274 = vmatpush.msra.mxu3 %v239_v8 }
  0xb3   :  { %v147_v45 = vpop.f32.mrf.mxu0 }
  0xb4   :  { %v148_v46 = vadd.f32 %v307_v44, %v147_v45 }
  0xb6   :  { %311 = vtanh.f32 %v148_v46 }
  0xbc   :  { %v312_v47 = vpop.eup %311 }
  0xbd   :  { %189 = vmatmul.f32.vlgmr.msra.gmra.mxu1 %v312_v47 }
 0x13a   :  { %v190_v1 = vpop.f32.mrf.mxu1 }
 0x13b   :  { %v191_v2 = vadd.f32 %v308_v0, %v190_v1 }
 0x13d   :  { %313 = vtanh.f32 %v191_v2 }
 0x143   :  { %v314_v3 = vpop.eup %313 }
 0x144   :  { %232 = vmatmul.f32.vlgmr.msra.gmra.mxu2 %v314_v3 }
 0x1c7   :  { %v233_v10 = vpop.f32.mrf.mxu2 }
 0x1c8   :  { %v234_v11 = vadd.f32 %v309_v9, %v233_v10 }
 0x1ca   :  { %315 = vtanh.f32 %v234_v11 }
 0x1d0   :  { %v316_v12 = vpop.eup %315 }
 0x1d1   :  { %275 = vmatmul.f32.vlgmr.msra.gmra.mxu3 %v316_v12 }
 0x254   :  { %v276_v14 = vpop.f32.mrf.mxu3 }
 0x255   :  { %v277_v15 = vadd.f32 %v310_v13, %v276_v14 }
 0x257   :  { %279 = vst [vmem:[#allocation13] sm:$0xff] %v277_v15 }
 0x258   :  { %290 = dma.vmem_to_hbm [thread:$0]  %s286_s17, 128, %s288_s20, [#allocation6]  }
 0x259   :  { %467 = dma.done.wait [#allocation6], 128  }
 0x25a   :  { %468 = vsyncadd [#allocation6], 4294967168 }
 0x25b   :  { %295 = vsyncpa [#allocation5], 1 }
 0x25c   :  { %296 = vsyncpa [#allocation8], 1 }
 0x25d   :  { %297 = vsyncpa [#allocation11], 1 }
 0x25e   :  { %298 = vsyncpa [#allocation6], 1 }

</bundles_post_ra>
